<compile_context>
chip_gen: v7x
topology: tpu7x:2x2x1
jax: 0.10.0
libtpu: 0.0.40
codegen_flags: <defaults>
</compile_context>

<pallas_src>
import jax
import jax.numpy as jnp
from jax.experimental import pallas as pl
from jax.experimental.pallas import tpu as pltpu


_LANE = 128
# Per-(Bb, C, ts) tile cap: with 2 input + 2 output double buffers this keeps
# total buffering <= ~16-20 MiB, safe on v5e/v6e/v7x (incl. v7x's 64 MiB VMEM).
_BLOCK_BYTE_CAP = 4 * 1024 * 1024


def _round_up(n, m):
    return (n + m - 1) // m * m


def _largest_divisor_leq(n, cap):
    cap = max(1, min(n, cap))
    for d in range(cap, 0, -1):
        if n % d == 0:
            return d
    return 1


def _pick_tiles(B, C, S, itemsize):
    """Pick (Bb, ts, S_pad) obeying the VMEM block budget and lane density."""
    S_128 = _round_up(S, _LANE)
    k = S_128 // _LANE
    # Lane-tile budget in units of 128 lanes.
    cap_units = max(1, _BLOCK_BYTE_CAP // max(1, C * itemsize * _LANE))
    if S % _LANE == 0:
        # No padding copy needed: pick the largest 128-multiple tile that both
        # divides S exactly and fits the VMEM budget.
        ts = _largest_divisor_leq(k, cap_units) * _LANE
        S_pad = S
    else:
        # A padded copy of x is unavoidable; use the largest lane tile allowed.
        ts = min(k, cap_units) * _LANE
        S_pad = _round_up(S_128, ts)
    # Batch tile: amortize the ~0.35us per-grid-step overhead for tiny slabs,
    # but keep >= 2 B-steps so the "parallel" axis can shard across 2 TCs.
    bb_by_bytes = max(1, _BLOCK_BYTE_CAP // max(1, C * ts * itemsize))
    bb_cap = min(bb_by_bytes, max(1, B // 2)) if B > 1 else 1
    Bb = _largest_divisor_leq(B, bb_cap)
    return Bb, ts, S_pad


def _pool_kernel(x_ref, sum_ref):
    # x_ref: (Bb, C, ts); sum_ref: (Bb, C, 1) f32, resident across the S axis.
    @pl.when(pl.program_id(1) == 0)
    def _():
        sum_ref[...] = jnp.zeros_like(sum_ref)

    x = x_ref[...].astype(jnp.float32)                       # f32 accumulation
    sum_ref[...] += jnp.sum(x, axis=-1, keepdims=True)       # (Bb, C, 1)


def _rescale_kernel(g_ref, x_ref, o_ref):
    # g_ref: (Bb, C, 1) in x's dtype; x_ref/o_ref: (Bb, C, ts).
    # Broadcast multiply in the native dtype (no f32 temp of the big tile).
    o_ref[...] = x_ref[...] * g_ref[...]


def se_layer_3d(x, fc1_w, fc2_w):
    """x: (B, C, D, H, W); fc1_w: (C//r, C); fc2_w: (C, C//r). Returns x's shape."""
    B, C, D, H, W = x.shape
    S = D * H * W
    itemsize = jnp.dtype(x.dtype).itemsize

    Bb, ts, S_pad = _pick_tiles(B, C, S, itemsize)
    n_b = B // Bb
    n_s = S_pad // ts

    # VMEM budget from the actual block sizes (double-buffered in + out plus
    # the tiny gate/sum blocks), clamped to values safe on every chip gen.
    block_bytes = Bb * C * ts * itemsize
    vmem_limit = int(min(40 * 1024 * 1024,
                         max(32 * 1024 * 1024, 5 * block_bytes + (1 << 20))))

    x2 = x.reshape(B, C, S)
    if S_pad != S:
        # Zero-pad so every S tile is a full, lane-dense (128-multiple) block
        # (unmasked stores). Zeros do not perturb the pooled sum; the mean
        # below divides by the *true* S.
        x2 = jnp.pad(x2, ((0, 0), (0, 0), (0, S_pad - S)))

    # ---- kernel 1: global average pool (sum accumulation over S tiles) ----
    sums = pl.pallas_call(
        _pool_kernel,
        out_shape=jax.ShapeDtypeStruct((B, C, 1), jnp.float32),
        grid_spec=pltpu.PrefetchScalarGridSpec(
            num_scalar_prefetch=0,
            grid=(n_b, n_s),
            in_specs=[pl.BlockSpec((Bb, C, ts), lambda b, s: (b, 0, s))],
            out_specs=pl.BlockSpec((Bb, C, 1), lambda b, s: (b, 0, 0)),
        ),
        compiler_params=pltpu.CompilerParams(
            dimension_semantics=("parallel", "arbitrary"),
            vmem_limit_bytes=vmem_limit),
    )(x2)

    # ---- excitation: fc1 -> ReLU -> fc2 -> sigmoid for all B at once in JAX
    #      (negligible FLOPs, kept off the streaming kernels' critical path) ----
    y = sums[:, :, 0] * (1.0 / float(S))                            # (B, C)
    h = jnp.maximum(jnp.dot(y, fc1_w.T.astype(jnp.float32)), 0.0)   # (B, C//r)
    g = jax.nn.sigmoid(jnp.dot(h, fc2_w.T.astype(jnp.float32)))     # (B, C)
    gates = g.astype(x.dtype)[:, :, None]                           # (B, C, 1)

    # ---- kernel 2: channel-wise rescale (pure streaming, lane-dense) ----
    out = pl.pallas_call(
        _rescale_kernel,
        out_shape=jax.ShapeDtypeStruct((B, C, S_pad), x.dtype),
        grid_spec=pltpu.PrefetchScalarGridSpec(
            num_scalar_prefetch=0,
            grid=(n_b, n_s),
            in_specs=[
                pl.BlockSpec((Bb, C, 1), lambda b, s: (b, 0, 0)),
                pl.BlockSpec((Bb, C, ts), lambda b, s: (b, 0, s)),
            ],
            out_specs=pl.BlockSpec((Bb, C, ts), lambda b, s: (b, 0, s)),
        ),
        compiler_params=pltpu.CompilerParams(
            dimension_semantics=("parallel", "parallel"),
            vmem_limit_bytes=vmem_limit),
    )(gates, x2)

    if S_pad != S:
        out = out[:, :, :S]
    return out.reshape(B, C, D, H, W)


def _reference(x, fc1_w, fc2_w):
    # Pure-JAX reference mirroring the PyTorch forward exactly.
    B, C = x.shape[0], x.shape[1]
    y = jnp.mean(x, axis=(2, 3, 4))          # AdaptiveAvgPool3d(1).view(b, c)
    y = jnp.maximum(y @ fc1_w.T, 0.0)        # fc1 + relu
    y = jax.nn.sigmoid(y @ fc2_w.T)          # fc2 + sigmoid
    return x * y.reshape(B, C, 1, 1, 1)


if __name__ == "__main__":
    key = jax.random.PRNGKey(0)
    k_x, k_w1, k_w2 = jax.random.split(key, 3)

    # Small shapes consistent with the module: in_channels=32, reduction=16 -> hidden=2.
    B, C, D, H, W = 2, 32, 8, 8, 8
    reduction = 16
    Ch = C // reduction

    x = jax.random.normal(k_x, (B, C, D, H, W), dtype=jnp.float32)
    # Deterministic synthetic Linear weights (PyTorch shape convention: (out, in)).
    fc1_w = jax.random.normal(k_w1, (Ch, C), dtype=jnp.float32) * 0.1
    fc2_w = jax.random.normal(k_w2, (C, Ch), dtype=jnp.float32) * 0.1

    out = jax.jit(se_layer_3d)(x, fc1_w, fc2_w)
    out = jax.block_until_ready(out)

    ref = _reference(x, fc1_w, fc2_w)
    assert out.shape == x.shape
    assert jnp.allclose(out, ref, atol=1e-5, rtol=1e-5), "mismatch vs reference"

    print("KERNEL_OK")
</pallas_src>

<mosaic_0001>
module attributes {stable_mosaic.version = 11 : i64} {
  func.func @_pool_kernel(%arg0: i32, %arg1: i32, %arg2: memref<1x32x512xf32, #tpu.memory_space<vmem>>, %arg3: memref<1x32x1xf32, #tpu.memory_space<vmem>>) attributes {dimension_semantics = [#tpu.dimension_semantics<parallel>, #tpu.dimension_semantics<arbitrary>], iteration_bounds = array<i64: 2, 1>, scalar_prefetch = 0 : i64, scratch_operands = 0 : i64, tpu.core_type = #tpu.core_type<tc>, window_params = [{transform_indices = @transform_0, window_bounds = array<i64: 1, 32, 512>}, {transform_indices = @transform_1, window_bounds = array<i64: 1, 32, 1>}]} {
    %c0_i32 = arith.constant 0 : i32
    %0 = arith.cmpi eq, %arg1, %c0_i32 : i32
    %1 = arith.extui %0 : i1 to i32
    %c0_i32_0 = arith.constant 0 : i32
    %2 = arith.cmpi ne, %1, %c0_i32_0 : i32
    scf.if %2 {
      %cst_9 = arith.constant 0.000000e+00 : f32
      %9 = vector.broadcast %cst_9 : f32 to vector<1x32x1xf32>
      %c0_10 = arith.constant 0 : index
      %c0_11 = arith.constant 0 : index
      %c0_12 = arith.constant 0 : index
      %10 = vector.load %arg3[%c0_10, %c0_11, %c0_12] : memref<1x32x1xf32, #tpu.memory_space<vmem>>, vector<1x32x1xf32>
      tpu.vector_store %arg3[%c0_10, %c0_11, %c0_12], %9 {strides = array<i32>} : memref<1x32x1xf32, #tpu.memory_space<vmem>>, vector<1x32x1xf32>,
    } else {
    }
    %c0 = arith.constant 0 : index
    %c0_1 = arith.constant 0 : index
    %c0_2 = arith.constant 0 : index
    %3 = vector.load %arg2[%c0, %c0_1, %c0_2] : memref<1x32x512xf32, #tpu.memory_space<vmem>>, vector<1x32x512xf32>
    %c0_3 = arith.constant 0 : index
    %c0_4 = arith.constant 0 : index
    %c0_5 = arith.constant 0 : index
    %4 = vector.load %arg3[%c0_3, %c0_4, %c0_5] : memref<1x32x1xf32, #tpu.memory_space<vmem>>, vector<1x32x1xf32>
    %cst = arith.constant dense<0.000000e+00> : vector<1x32xf32>
    %5 = vector.multi_reduction <add>, %3, %cst [2] : vector<1x32x512xf32> to vector<1x32xf32>
    %6 = vector.shape_cast %5 : vector<1x32xf32> to vector<1x32x1xf32>
    %7 = arith.addf %4, %6 : vector<1x32x1xf32>
    %c0_6 = arith.constant 0 : index
    %c0_7 = arith.constant 0 : index
    %c0_8 = arith.constant 0 : index
    %8 = vector.load %arg3[%c0_6, %c0_7, %c0_8] : memref<1x32x1xf32, #tpu.memory_space<vmem>>, vector<1x32x1xf32>
    tpu.vector_store %arg3[%c0_6, %c0_7, %c0_8], %7 {strides = array<i32>} : memref<1x32x1xf32, #tpu.memory_space<vmem>>, vector<1x32x1xf32>,
    return
  }
  func.func @transform_0(%arg0: i32, %arg1: i32) -> (i32, i32, i32) {
    %c0_i32 = arith.constant 0 : i32
    %c0_i32_0 = arith.constant 0 : i32
    return %arg0, %c0_i32, %arg1 : i32, i32, i32
  }
  func.func @transform_1(%arg0: i32, %arg1: i32) -> (i32, i32, i32) {
    %c0_i32 = arith.constant 0 : i32
    %c0_i32_0 = arith.constant 0 : i32
    %c0_i32_1 = arith.constant 0 : i32
    return %arg0, %c0_i32, %c0_i32_0 : i32, i32, i32
  }
}

module attributes {stable_mosaic.version = 11 : i64} {
  func.func @_rescale_kernel(%arg0: i32, %arg1: i32, %arg2: memref<1x32x1xf32, #tpu.memory_space<vmem>>, %arg3: memref<1x32x512xf32, #tpu.memory_space<vmem>>, %arg4: memref<1x32x512xf32, #tpu.memory_space<vmem>>) attributes {dimension_semantics = [#tpu.dimension_semantics<parallel>, #tpu.dimension_semantics<parallel>], iteration_bounds = array<i64: 2, 1>, scalar_prefetch = 0 : i64, scratch_operands = 0 : i64, tpu.core_type = #tpu.core_type<tc>, window_params = [{transform_indices = @transform_0, window_bounds = array<i64: 1, 32, 1>}, {transform_indices = @transform_1, window_bounds = array<i64: 1, 32, 512>}, {transform_indices = @transform_2, window_bounds = array<i64: 1, 32, 512>}]} {
    %c0 = arith.constant 0 : index
    %c0_0 = arith.constant 0 : index
    %c0_1 = arith.constant 0 : index
    %0 = vector.load %arg3[%c0, %c0_0, %c0_1] : memref<1x32x512xf32, #tpu.memory_space<vmem>>, vector<1x32x512xf32>
    %c0_2 = arith.constant 0 : index
    %c0_3 = arith.constant 0 : index
    %c0_4 = arith.constant 0 : index
    %1 = vector.load %arg2[%c0_2, %c0_3, %c0_4] : memref<1x32x1xf32, #tpu.memory_space<vmem>>, vector<1x32x1xf32>
    %2 = vector.broadcast %1 : vector<1x32x1xf32> to vector<1x32x512xf32>
    %3 = arith.mulf %0, %2 : vector<1x32x512xf32>
    %c0_5 = arith.constant 0 : index
    %c0_6 = arith.constant 0 : index
    %c0_7 = arith.constant 0 : index
    %4 = vector.load %arg4[%c0_5, %c0_6, %c0_7] : memref<1x32x512xf32, #tpu.memory_space<vmem>>, vector<1x32x512xf32>
    tpu.vector_store %arg4[%c0_5, %c0_6, %c0_7], %3 {strides = array<i32>} : memref<1x32x512xf32, #tpu.memory_space<vmem>>, vector<1x32x512xf32>,
    return
  }
  func.func @transform_0(%arg0: i32, %arg1: i32) -> (i32, i32, i32) {
    %c0_i32 = arith.constant 0 : i32
    %c0_i32_0 = arith.constant 0 : i32
    %c0_i32_1 = arith.constant 0 : i32
    return %arg0, %c0_i32, %c0_i32_0 : i32, i32, i32
  }
  func.func @transform_1(%arg0: i32, %arg1: i32) -> (i32, i32, i32) {
    %c0_i32 = arith.constant 0 : i32
    %c0_i32_0 = arith.constant 0 : i32
    return %arg0, %c0_i32, %arg1 : i32, i32, i32
  }
  func.func @transform_2(%arg0: i32, %arg1: i32) -> (i32, i32, i32) {
    %c0_i32 = arith.constant 0 : i32
    %c0_i32_0 = arith.constant 0 : i32
    return %arg0, %c0_i32, %arg1 : i32, i32, i32
  }
}

</mosaic_0001>

<bundles_post_ra>
// kernel: se_layer_3d.2
= control target key start
LH: loop header
LB: loop body
LE: loop exit
PB: predicated region body
PF: predicated region fallthrough
CT: control target
= control target key end

     0   :  { %s345_s6 = smov 0   ;;  %s347_s7 = smov 0   ;;  %s418_s0 = inlined_call_operand.vmem [shape: f32[2,32,512], index: 0, kind: input, shape index: {}]   ;;  %s419_s1 = inlined_call_operand.vmem [shape: f32[2,32,1], index: 1, kind: output, shape index: {}]  }
   0x1   :  { %s349_s8 = smov 0  }
   0x2 LB: > { %s23_s9 = sadd.s32 1, %s328_s7  ;;  %p276_p0 = scmp.ge.s32.totalorder %s332_s8, 1  ;;  %s332_s8 = sphi %s349_s8, %s11_s8   ;;  %s328_s7 = sphi %s347_s7, %s421_s7   ;;  %s324_s6 = sphi %s345_s6, %s420_s6  }
   0x3   : > { %p25_p1 = scmp.ge.s32.totalorder %s23_s9, 2  ;;  %p106_p2 = scmp.lt.s32.totalorder %s332_s8, 3 }
   0x5   : > { %s423_s9 = smov (%p25_p1, %s23_s9), 0  ;;  %p107_p3 = pnand %p276_p0, %p106_p2 }
   0x6   : > { %p131_p4 = scmp.lt.s32.totalorder (!%p107_p3), %s324_s6, 1  ;;  %vm149_vm0 = vcmask (!%p107_p3), 7168   ;;  %v334_v3 = vmov (!%p107_p3), 0.0  }
   0x7   : > { %110 = sbr.rel (%p107_p3) target bundleno = 174 (0xae), region = 24 }
   0xe   : > { %s425_s6 = smov (!%p131_p4, %s324_s6), 1 }
   0xf   : > { %s283_s10 = sshll.u32 %s425_s6, 7  ;;  %s284_s11 = sshll.u32 %s425_s6, 5 }
  0x10   : > { %s366_s14 = scalar_lea.vmem %s418_s0, %s283_s10  ;;  %s371_s17 = scalar_lea.vmem %s419_s1, %s284_s11 }
  0x11   : > { %v162_v0 = vld [vmem:[%s366_s14 + $0x40] sm:$0xff]  ;;  %v163_v1 = vld [vmem:[%s366_s14 + $0x48] sm:$0xff]  ;;  %v164_v2 = vld [vmem:[%s366_s14 + $0x50] sm:$0xff]  ;;  %152 = vst.msk [vmem:[%s371_s17 + $0x10] sm:$0xff] %vm149_vm0, %v334_v3 }
  0x12   : > { %150 = vst.msk [vmem:[%s371_s17] sm:$0xff] %vm149_vm0, %v334_v3  ;;  %151 = vst.msk [vmem:[%s371_s17 + $0x8] sm:$0xff] %vm149_vm0, %v334_v3  ;;  %v184_v4 = vadd.f32 %v163_v1, %v162_v0  ;;  %v154_v5 = vld [vmem:[%s366_s14] sm:$0xff]  ;;  %v155_v6 = vld [vmem:[%s366_s14 + $0x8] sm:$0xff] }
  0x13   : > { %153 = vst.msk [vmem:[%s371_s17 + $0x18] sm:$0xff] %vm149_vm0, %v334_v3  ;;  %v165_v7 = vld [vmem:[%s366_s14 + $0x58] sm:$0xff]  ;;  %v156_v8 = vld [vmem:[%s366_s14 + $0x10] sm:$0xff]  ;;  %v174_v9 = vadd.f32 %v155_v6, %v154_v5  ;;  %v166_v10 = vld [vmem:[%s366_s14 + $0x60] sm:$0xff] }
  0x14   : > { %v185_v11 = vadd.f32 %v184_v4, %v164_v2  ;;  %v157_v12 = vld [vmem:[%s366_s14 + $0x18] sm:$0xff]  ;;  %v167_v13 = vld [vmem:[%s366_s14 + $0x68] sm:$0xff]  ;;  %v168_v14 = vld [vmem:[%s366_s14 + $0x70] sm:$0xff] }
  0x15   : > { %v175_v15 = vadd.f32 %v174_v9, %v156_v8  ;;  %v189_v16 = vadd.f32 %v167_v13, %v166_v10  ;;  %v158_v17 = vld [vmem:[%s366_s14 + $0x20] sm:$0xff]  ;;  %v159_v18 = vld [vmem:[%s366_s14 + $0x28] sm:$0xff]  ;;  %v160_v19 = vld [vmem:[%s366_s14 + $0x30] sm:$0xff] }
  0x16   : > { %v186_v20 = vadd.f32 %v185_v11, %v165_v7  ;;  %v169_v21 = vld [vmem:[%s366_s14 + $0x78] sm:$0xff]  ;;  %v179_v22 = vadd.f32 %v159_v18, %v158_v17 }
  0x17   : > { %v176_v23 = vadd.f32 %v175_v15, %v157_v12  ;;  %v190_v24 = vadd.f32 %v189_v16, %v168_v14  ;;  %v161_v25 = vld [vmem:[%s366_s14 + $0x38] sm:$0xff] }
  0x18   : > { %187 = vadd.xlane.f32.xlu1 %v186_v20  ;;  %v180_v26 = vadd.f32 %v179_v22, %v160_v19  ;;  %v172_v29 = vld [vmem:[%s371_s17 + $0x10] sm:$0xff] }
  0x19   : > { %177 = vadd.xlane.f32.xlu0 %v176_v23  ;;  %v191_v27 = vadd.f32 %v190_v24, %v169_v21  ;;  %v170_v30 = vld [vmem:[%s371_s17] sm:$0xff]  ;;  %v171_v36 = vld [vmem:[%s371_s17 + $0x8] sm:$0xff] }
  0x1a   : > { %v181_v28 = vadd.f32 %v180_v26, %v161_v25  ;;  %v173_v35 = vld [vmem:[%s371_s17 + $0x18] sm:$0xff] }
  0x1c   : > { %192 = vadd.xlane.f32.xlu1 %v191_v27 }
  0x1d   : > { %182 = vadd.xlane.f32.xlu0 %v181_v28 }
  0xa5   : > { %v188_v31 = vpop.xlane.xlu1 %187 }
  0xa6   : > { %v196_v32 = vadd.f32 %v188_v31, %v172_v29  ;;  %v178_v33 = vpop.xlane.xlu0 %177 }
  0xa7   : > { %v194_v34 = vadd.f32 %v178_v33, %v170_v30 }
  0xa8   : > { %201 = vst.msk [vmem:[%s371_s17 + $0x10] sm:$0xff] %vm149_vm0, %v196_v32 }
  0xa9   : > { %199 = vst.msk [vmem:[%s371_s17] sm:$0xff] %vm149_vm0, %v194_v34  ;;  %v193_v37 = vpop.xlane.xlu1 %192 }
  0xaa   : > { %v197_v38 = vadd.f32 %v193_v37, %v173_v35  ;;  %v183_v39 = vpop.xlane.xlu0 %182 }
  0xab   : > { %v195_v40 = vadd.f32 %v183_v39, %v171_v36 }
  0xac   : > { %202 = vst.msk [vmem:[%s371_s17 + $0x18] sm:$0xff] %vm149_vm0, %v197_v38 }
  0xad   : > { %200 = vst.msk [vmem:[%s371_s17 + $0x8] sm:$0xff] %vm149_vm0, %v195_v40 }
  0xae PF: > { %s11_s8 = sadd.s32 1, %s332_s8   ;;  %s420_s6 = smov %s328_s7 }
  0xaf   : > { %p8_p5 = scmp.ge.s32.totalorder %s11_s8, 4   ;;  %s421_s7 = smov %s423_s9 }
  0xb1   :  { %10 = sbr.rel (!%p8_p5) target bundleno = 2 (0x2), region = 58 }

// kernel: se_layer_3d.3
= control target key start
LH: loop header
LB: loop body
LE: loop exit
PB: predicated region body
PF: predicated region fallthrough
CT: control target
= control target key end

     0   :  { %s457_s9 = smov 0   ;;  %s459_s10 = smov 0   ;;  %s529_s0 = inlined_call_operand.vmem [shape: f32[2,32,1], index: 0, kind: input, shape index: {}]   ;;  %s530_s1 = inlined_call_operand.vmem [shape: f32[2,32,512], index: 1, kind: input, shape index: {}]   ;;  %s531_s2 = inlined_call_operand.vmem [shape: f32[2,32,512], index: 2, kind: output, shape index: {}]  }
   0x1   :  { %s461_s11 = smov 0  }
   0x2 LB: > { %s24_s12 = sadd.s32 1, %s435_s10  ;;  %p378_p0 = scmp.ge.s32.totalorder %s439_s11, 1  ;;  %s439_s11 = sphi %s461_s11, %s12_s11   ;;  %s435_s10 = sphi %s459_s10, %s533_s10   ;;  %s431_s9 = sphi %s457_s9, %s532_s9  }
   0x3   : > { %p26_p1 = scmp.ge.s32.totalorder %s24_s12, 2  ;;  %p143_p2 = scmp.lt.s32.totalorder %s439_s11, 3 }
   0x5   : > { %s535_s12 = smov (%p26_p1, %s24_s12), 0  ;;  %p144_p3 = pnand %p378_p0, %p143_p2 }
   0x6   : > { %p178_p4 = scmp.lt.s32.totalorder (!%p144_p3), %s431_s9, 1  ;;  %v441_v0 = vmov (!%p144_p3), 0  }
   0x7   : > { %147 = sbr.rel (%p144_p3) target bundleno = 156 (0x9c), region = 28  ;;  %416 = vset.pattern.permute.xlu1 (!%p144_p3), %v441_v0  ;;  %415 = vset.pattern.permute.xlu0 (!%p144_p3), %v441_v0 }
   0xe   : > { %s537_s9 = smov (!%p178_p4, %s431_s9), 1 }
   0xf   : > { %s387_s13 = sshll.u32 %s537_s9, 5  ;;  %s388_s17 = sshll.u32 %s537_s9, 7 }
  0x10   : > { %s182_s16 = scalar_lea.vmem %s529_s0, %s387_s13  ;;  %s481_s20 = scalar_lea.vmem %s530_s1, %s388_s17 }
  0x11   : > { %v221_v1 = vld [vmem:[%s182_s16 + $0x10] sm:$0xff]  ;;  %v219_v2 = vld [vmem:[%s182_s16] sm:$0xff]  ;;  %v222_v3 = vld [vmem:[%s182_s16 + $0x18] sm:$0xff]  ;;  %s494_s23 = scalar_lea.vmem %s531_s2, %s388_s17 }
  0x12   : > { %235 = vperm.xlu1 %416, %v221_v1   ;;  %225 = vperm.xlu0 %415, %v219_v2   ;;  %v220_v4 = vld [vmem:[%s182_s16 + $0x8] sm:$0xff]  ;;  %v211_v5 = vld [vmem:[%s481_s20 + $0x40] sm:$0xff]  ;;  %v213_v7 = vld [vmem:[%s481_s20 + $0x50] sm:$0xff] }
  0x13   : > { %v212_v6 = vld [vmem:[%s481_s20 + $0x48] sm:$0xff]  ;;  %v214_v8 = vld [vmem:[%s481_s20 + $0x58] sm:$0xff]  ;;  %v203_v9 = vld [vmem:[%s481_s20] sm:$0xff] }
  0x14   : > { %v204_v10 = vld [vmem:[%s481_s20 + $0x8] sm:$0xff]  ;;  %v205_v11 = vld [vmem:[%s481_s20 + $0x10] sm:$0xff]  ;;  %v206_v12 = vld [vmem:[%s481_s20 + $0x18] sm:$0xff] }
  0x15   : > { %v215_v19 = vld [vmem:[%s481_s20 + $0x60] sm:$0xff]  ;;  %v216_v20 = vld [vmem:[%s481_s20 + $0x68] sm:$0xff]  ;;  %v217_v25 = vld [vmem:[%s481_s20 + $0x70] sm:$0xff] }
  0x16   : > { %240 = vperm.xlu1 %416, %v222_v3   ;;  %230 = vperm.xlu0 %415, %v220_v4   ;;  %v218_v26 = vld [vmem:[%s481_s20 + $0x78] sm:$0xff]  ;;  %v207_v27 = vld [vmem:[%s481_s20 + $0x20] sm:$0xff]  ;;  %v208_v28 = vld [vmem:[%s481_s20 + $0x28] sm:$0xff] }
  0x17   : > { %v209_v29 = vld [vmem:[%s481_s20 + $0x30] sm:$0xff]  ;;  %v210_v30 = vld [vmem:[%s481_s20 + $0x38] sm:$0xff] }
  0x91   : > { %v236_v13 = vpop.permute.xlu1 %235  ;;  %v226_v14 = vpop.permute.xlu0 %225 }
  0x92   : > { %v251_v15 = vmul.f32 %v236_v13, %v211_v5  ;;  %v252_v16 = vmul.f32 %v236_v13, %v212_v6  ;;  %v253_v17 = vmul.f32 %v236_v13, %v213_v7  ;;  %v254_v18 = vmul.f32 %v236_v13, %v214_v8 }
  0x93   : > { %v243_v21 = vmul.f32 %v226_v14, %v203_v9  ;;  %v244_v22 = vmul.f32 %v226_v14, %v204_v10  ;;  %v245_v23 = vmul.f32 %v226_v14, %v205_v11  ;;  %v246_v24 = vmul.f32 %v226_v14, %v206_v12 }
  0x94   : > { %267 = vst [vmem:[%s494_s23 + $0x40] sm:$0xff] %v251_v15  ;;  %268 = vst [vmem:[%s494_s23 + $0x48] sm:$0xff] %v252_v16 }
  0x95   : > { %269 = vst [vmem:[%s494_s23 + $0x50] sm:$0xff] %v253_v17  ;;  %270 = vst [vmem:[%s494_s23 + $0x58] sm:$0xff] %v254_v18  ;;  %v241_v31 = vpop.permute.xlu1 %240  ;;  %v231_v32 = vpop.permute.xlu0 %230 }
  0x96   : > { %259 = vst [vmem:[%s494_s23] sm:$0xff] %v243_v21  ;;  %260 = vst [vmem:[%s494_s23 + $0x8] sm:$0xff] %v244_v22  ;;  %v255_v33 = vmul.f32 %v241_v31, %v215_v19  ;;  %v256_v34 = vmul.f32 %v241_v31, %v216_v20  ;;  %v257_v35 = vmul.f32 %v241_v31, %v217_v25 }
  0x97   : > { %261 = vst [vmem:[%s494_s23 + $0x10] sm:$0xff] %v245_v23  ;;  %262 = vst [vmem:[%s494_s23 + $0x18] sm:$0xff] %v246_v24  ;;  %v258_v36 = vmul.f32 %v241_v31, %v218_v26  ;;  %v247_v37 = vmul.f32 %v231_v32, %v207_v27  ;;  %v248_v38 = vmul.f32 %v231_v32, %v208_v28 }
  0x98   : > { %v249_v39 = vmul.f32 %v231_v32, %v209_v29  ;;  %v250_v40 = vmul.f32 %v231_v32, %v210_v30  ;;  %271 = vst [vmem:[%s494_s23 + $0x60] sm:$0xff] %v255_v33  ;;  %272 = vst [vmem:[%s494_s23 + $0x68] sm:$0xff] %v256_v34 }
  0x99   : > { %273 = vst [vmem:[%s494_s23 + $0x70] sm:$0xff] %v257_v35  ;;  %274 = vst [vmem:[%s494_s23 + $0x78] sm:$0xff] %v258_v36 }
  0x9a   : > { %263 = vst [vmem:[%s494_s23 + $0x20] sm:$0xff] %v247_v37  ;;  %264 = vst [vmem:[%s494_s23 + $0x28] sm:$0xff] %v248_v38 }
  0x9b   : > { %265 = vst [vmem:[%s494_s23 + $0x30] sm:$0xff] %v249_v39  ;;  %266 = vst [vmem:[%s494_s23 + $0x38] sm:$0xff] %v250_v40 }
  0x9c PF: > { %s12_s11 = sadd.s32 1, %s439_s11   ;;  %s532_s9 = smov %s435_s10 }
  0x9d   : > { %p9_p5 = scmp.ge.s32.totalorder %s12_s11, 4   ;;  %s533_s10 = smov %s535_s12 }
  0x9f   :  { %11 = sbr.rel (!%p9_p5) target bundleno = 2 (0x2), region = 61 }

</bundles_post_ra>
